<compile_context>
chip_gen: v7x
topology: tpu7x:2x2x1
jax: 0.10.0
libtpu: 0.0.40
codegen_flags: <defaults>
</compile_context>

<pallas_src>
import jax
import jax.numpy as jnp
from jax.experimental import pallas as pl
from jax.experimental.pallas import tpu as pltpu


def cnn_kernel(x_ref, w_ref, b_ref, o_ref):
    # x_ref: (B_blk, L, Cin) bf16   w_ref: (K*Cin, Cp) bf16
    # b_ref: (1, Cp) f32            o_ref: (B_blk, Cp)
    Bb, L, Cin = x_ref.shape
    KCin, Cp = w_ref.shape
    K = KCin // Cin
    Lout = L - K + 1

    x = x_ref[...]  # load the whole tile once

    # im2col: gather the K shifted windows along the lane axis (static offsets,
    # K is a Python int), then a single MXU matmul with f32 accumulation.
    cols = jnp.concatenate([x[:, j:j + Lout, :] for j in range(K)], axis=-1)
    xs = cols.reshape(Bb * Lout, KCin)                       # (Bb*Lout, K*Cin)
    acc = jnp.dot(xs, w_ref[...],
                  preferred_element_type=jnp.float32)        # (Bb*Lout, Cp) f32

    # Max-pool over the length first, then bias + ReLU on the small result:
    #   max_t relu(s_t + b) == relu(max_t(s_t) + b)
    pooled = jnp.max(acc.reshape(Bb, Lout, Cp), axis=1)      # (Bb, Cp)
    o_ref[...] = jnp.maximum(pooled + b_ref[...], 0.0).astype(o_ref.dtype)


def cnn_forward_blc(x_blc, w_flat, b_pad, *, out_c, out_dtype, b_blk=128):
    """Core entry point: channel-last activations, padded flat weights.

    x_blc:  (B, L, Cin) bfloat16
    w_flat: (K*Cin, Cp) bfloat16, Cp a multiple of 128, zero-padded past out_c
    b_pad:  (1, Cp) float32, zero-padded past out_c
    returns (B, out_c) in out_dtype
    """
    B, L, Cin = x_blc.shape
    KCin, Cp = w_flat.shape

    B_blk = min(B, b_blk)
    B_pad = pl.cdiv(B, B_blk) * B_blk
    if B_pad != B:
        x_blc = jnp.pad(x_blc, ((0, B_pad - B), (0, 0), (0, 0)))

    out = pl.pallas_call(
        cnn_kernel,
        out_shape=jax.ShapeDtypeStruct((B_pad, Cp), jnp.float32),
        grid=(B_pad // B_blk,),
        in_specs=[
            pl.BlockSpec((B_blk, L, Cin), lambda i: (i, 0, 0)),
            pl.BlockSpec((KCin, Cp), lambda i: (0, 0)),
            pl.BlockSpec((1, Cp), lambda i: (0, 0)),
        ],
        out_specs=pl.BlockSpec((B_blk, Cp), lambda i: (i, 0)),
        compiler_params=pltpu.CompilerParams(
            dimension_semantics=("parallel",)),
    )(x_blc, w_flat, b_pad)

    return out[:B, :out_c].astype(out_dtype)


def cnn_forward(x_ncl, weight_oik, bias_o, *, b_blk=128):
    """PyTorch-layout wrapper.

    x_ncl: (B, in_c, L) float32; weight_oik: (out_c, in_c, k); bias_o: (out_c,)
    """
    B, in_c, L = x_ncl.shape
    out_c, _, k = weight_oik.shape
    assert L - k + 1 >= 1, "word length must be >= kernel size"

    Cp = ((out_c + 127) // 128) * 128
    Cp = max(Cp, 128)

    # Layout glue (see TODO at top: producers should supply (B, L, Cin) directly).
    x_blc = jnp.transpose(x_ncl, (0, 2, 1)).astype(jnp.bfloat16)      # (B, L, Cin)
    w_flat = jnp.transpose(weight_oik, (2, 1, 0)).reshape(k * in_c, out_c)
    w_flat = jnp.pad(w_flat, ((0, 0), (0, Cp - out_c))).astype(jnp.bfloat16)
    b_pad = jnp.pad(bias_o, (0, Cp - out_c)).reshape(1, Cp).astype(jnp.float32)

    return cnn_forward_blc(x_blc, w_flat, b_pad,
                           out_c=out_c, out_dtype=x_ncl.dtype, b_blk=b_blk)


def reference_forward(x_ncl, weight_oik, bias_o):
    """Plain-JAX reference matching PyTorch Conv1d->ReLU->MaxPool->view."""
    conv = jax.lax.conv_general_dilated(
        x_ncl, weight_oik,
        window_strides=(1,), padding="VALID",
        dimension_numbers=("NCH", "OIH", "NCH"),
        precision=jax.lax.Precision.HIGHEST,
    ) + bias_o[None, :, None]
    relu = jnp.maximum(conv, 0.0)
    return jnp.max(relu, axis=-1)  # (B, out_c)


if __name__ == "__main__":
    # Small shapes consistent with the module: (batch, char_embed_dim, word_length)
    B, in_c, L = 2, 4, 16
    out_c, k = 8, 5

    key = jax.random.PRNGKey(0)
    kx, kw, kb = jax.random.split(key, 3)

    x = jax.random.normal(kx, (B, in_c, L), dtype=jnp.float32)

    # Deterministic parameter init (shapes from nn.Conv1d(in_c, out_c, k)):
    # weight: xavier_uniform_, bias: PyTorch Conv1d default U(-1/sqrt(fan_in), ...)
    fan_in = in_c * k
    fan_out = out_c * k
    xavier_bound = float(jnp.sqrt(6.0 / (fan_in + fan_out)))
    weight = jax.random.uniform(kw, (out_c, in_c, k), jnp.float32,
                                minval=-xavier_bound, maxval=xavier_bound)
    b_bound = 1.0 / float(jnp.sqrt(fan_in))
    bias = jax.random.uniform(kb, (out_c,), jnp.float32,
                              minval=-b_bound, maxval=b_bound)

    out = jax.block_until_ready(cnn_forward(x, weight, bias))
    assert out.shape == (B, out_c)

    # Tight check: reference fed the same bf16-rounded inputs (kernel uses bf16
    # operands with f32 accumulation).
    xq = x.astype(jnp.bfloat16).astype(jnp.float32)
    wq = weight.astype(jnp.bfloat16).astype(jnp.float32)
    ref_q = jax.block_until_ready(reference_forward(xq, wq, bias))
    assert jnp.allclose(out, ref_q, atol=1e-4, rtol=1e-4), "mismatch vs bf16-input reference"

    # Loose sanity check against the full-precision reference (bf16 rounding only).
    ref = jax.block_until_ready(reference_forward(x, weight, bias))
    assert jnp.allclose(out, ref, atol=1e-1, rtol=1e-1), "mismatch vs f32 reference"

    print("KERNEL_OK")
</pallas_src>

<mosaic_0001>
module attributes {stable_mosaic.version = 11 : i64} {
  func.func @cnn_kernel(%arg0: i32, %arg1: memref<2x16x4xbf16, #tpu.memory_space<vmem>>, %arg2: memref<20x128xbf16, #tpu.memory_space<vmem>>, %arg3: memref<1x128xf32, #tpu.memory_space<vmem>>, %arg4: memref<2x128xf32, #tpu.memory_space<vmem>>) attributes {dimension_semantics = [#tpu.dimension_semantics<parallel>], iteration_bounds = array<i64: 1>, scalar_prefetch = 0 : i64, scratch_operands = 0 : i64, tpu.core_type = #tpu.core_type<tc>, window_params = [{transform_indices = @transform_0, window_bounds = array<i64: 2, 16, 4>}, {pipeline_mode = #tpu.pipeline_mode<synchronous>, transform_indices = @transform_1, window_bounds = array<i64: 20, 128>}, {pipeline_mode = #tpu.pipeline_mode<synchronous>, transform_indices = @transform_2, window_bounds = array<i64: 1, 128>}, {transform_indices = @transform_3, window_bounds = array<i64: 2, 128>}]} {
    %c0 = arith.constant 0 : index
    %c0_0 = arith.constant 0 : index
    %c0_1 = arith.constant 0 : index
    %0 = vector.load %arg1[%c0, %c0_0, %c0_1] : memref<2x16x4xbf16, #tpu.memory_space<vmem>>, vector<2x16x4xbf16>
    %1 = vector.extract_strided_slice %0 {offsets = [0, 0, 0], sizes = [2, 12, 4], strides = [1, 1, 1]} : vector<2x16x4xbf16> to vector<2x12x4xbf16>
    %2 = vector.extract_strided_slice %0 {offsets = [0, 1, 0], sizes = [2, 12, 4], strides = [1, 1, 1]} : vector<2x16x4xbf16> to vector<2x12x4xbf16>
    %3 = vector.extract_strided_slice %0 {offsets = [0, 2, 0], sizes = [2, 12, 4], strides = [1, 1, 1]} : vector<2x16x4xbf16> to vector<2x12x4xbf16>
    %4 = vector.extract_strided_slice %0 {offsets = [0, 3, 0], sizes = [2, 12, 4], strides = [1, 1, 1]} : vector<2x16x4xbf16> to vector<2x12x4xbf16>
    %5 = vector.extract_strided_slice %0 {offsets = [0, 4, 0], sizes = [2, 12, 4], strides = [1, 1, 1]} : vector<2x16x4xbf16> to vector<2x12x4xbf16>
    %6 = tpu.concatenate %1, %2, %3, %4, %5 in 2 : vector<2x12x4xbf16>, vector<2x12x4xbf16>, vector<2x12x4xbf16>, vector<2x12x4xbf16>, vector<2x12x4xbf16> -> vector<2x12x20xbf16>
    %7 = vector.shape_cast %6 : vector<2x12x20xbf16> to vector<24x20xbf16>
    %c0_2 = arith.constant 0 : index
    %c0_3 = arith.constant 0 : index
    %8 = vector.load %arg2[%c0_2, %c0_3] : memref<20x128xbf16, #tpu.memory_space<vmem>>, vector<20x128xbf16>
    %cst = arith.constant dense<0.000000e+00> : vector<24x128xf32>
    %9 = tpu.matmul %7, %8, %cst {dimension_numbers = #tpu.dot_dimension_numbers<[1], [0], [0], [1], [0, 0, 1, 1], [], []>} : vector<24x20xbf16>, vector<20x128xbf16>, vector<24x128xf32> -> vector<24x128xf32>
    %10 = vector.shape_cast %9 : vector<24x128xf32> to vector<2x12x128xf32>
    %cst_4 = arith.constant dense<0xFF800000> : vector<2x128xf32>
    %11 = vector.multi_reduction <maximumf>, %10, %cst_4 [1] : vector<2x12x128xf32> to vector<2x128xf32>
    %c0_5 = arith.constant 0 : index
    %c0_6 = arith.constant 0 : index
    %12 = vector.load %arg3[%c0_5, %c0_6] : memref<1x128xf32, #tpu.memory_space<vmem>>, vector<1x128xf32>
    %13 = vector.broadcast %12 : vector<1x128xf32> to vector<2x128xf32>
    %14 = arith.addf %11, %13 : vector<2x128xf32>
    %cst_7 = arith.constant 0.000000e+00 : f32
    %15 = vector.broadcast %cst_7 : f32 to vector<2x128xf32>
    %16 = arith.maximumf %14, %15 : vector<2x128xf32>
    %c0_8 = arith.constant 0 : index
    %c0_9 = arith.constant 0 : index
    %17 = vector.load %arg4[%c0_8, %c0_9] : memref<2x128xf32, #tpu.memory_space<vmem>>, vector<2x128xf32>
    tpu.vector_store %arg4[%c0_8, %c0_9], %16 {strides = array<i32>} : memref<2x128xf32, #tpu.memory_space<vmem>>, vector<2x128xf32>,
    return
  }
  func.func @transform_0(%arg0: i32) -> (i32, i32, i32) {
    %c0_i32 = arith.constant 0 : i32
    %c0_i32_0 = arith.constant 0 : i32
    %c0_i32_1 = arith.constant 0 : i32
    return %arg0, %c0_i32, %c0_i32_0 : i32, i32, i32
  }
  func.func @transform_1(%arg0: i32) -> (i32, i32) {
    %c0_i32 = arith.constant 0 : i32
    %c0_i32_0 = arith.constant 0 : i32
    %c0_i32_1 = arith.constant 0 : i32
    return %c0_i32, %c0_i32_0 : i32, i32
  }
  func.func @transform_2(%arg0: i32) -> (i32, i32) {
    %c0_i32 = arith.constant 0 : i32
    %c0_i32_0 = arith.constant 0 : i32
    %c0_i32_1 = arith.constant 0 : i32
    return %c0_i32, %c0_i32_0 : i32, i32
  }
  func.func @transform_3(%arg0: i32) -> (i32, i32) {
    %c0_i32 = arith.constant 0 : i32
    %c0_i32_0 = arith.constant 0 : i32
    return %arg0, %c0_i32 : i32, i32
  }
}

</mosaic_0001>

<bundles_post_ra>
// kernel: tpu_custom_call.1
= control target key start
LH: loop header
LB: loop body
LE: loop exit
PB: predicated region body
PF: predicated region fallthrough
CT: control target
= control target key end

     0   :  { %s334_s16 = smov 16   ;;  %s335_s17 = smov 8   ;;  %s389_s0 = inlined_call_operand.vmem [shape: bf16[2,16,4], index: 0, kind: input, shape index: {}]   ;;  %s390_s1 = inlined_call_operand.vmem [shape: bf16[20,128], index: 1, kind: input, shape index: {}]   ;;  %s391_s2 = inlined_call_operand.vmem [shape: f32[1,128], index: 2, kind: input, shape index: {}]   ;;  %s392_s3 = inlined_call_operand.hbm [shape: f32[2,128], index: 3, kind: output, shape index: {}]  }
   0x1   :  { %v306_v0 = vld [vmem:[%s389_s0] sm:$0xff]   ;;  %v307_v1 = vld [vmem:[%s389_s0 + $0x8] sm:$0xff]  }
   0x2   :  { %v64_v2 = vrot.slane %v306_v0, 2  ;;  %v48_v3 = vrot.slane %v306_v0, 1  ;;  %v31_v4 = vshrl.u32 %v306_v0, 16  ;;  %v33_v5 = vshll.u32 %v306_v0, 16  ;;  %v308_v13 = vld [vmem:[%s390_s1] sm:$0xff]  }
   0x3   :  { %v38_v6 = vshrl.u32 %v307_v1, 16  ;;  %v40_v7 = vshll.u32 %v307_v1, 16  ;;  %v49_v8 = vrot.slane %v307_v1, 1 }
   0x4   :  { %66 = vrot.lane.b32.xlu1 %v64_v2, %s334_s16  ;;  %50 = vrot.lane.b32.xlu0 %v48_v3, %s335_s17  ;;  %v35_v9 = vrot.slane %v33_v5, 1  ;;  %v54_v11 = vrot.slane %v31_v4, 1  ;;  %v55_v12 = vrot.slane %v33_v5, 2 }
   0x5   :  { %v42_v10 = vrot.slane %v40_v7, 1 }
   0x6   :  { %8 = vsyncpa [#allocation3], 0  ;;  %291 = vmatprep.subr.bf16.mxu0 %v308_v13  ;;  %v36_v15 = vor.u32 %v35_v9, %v31_v4  ;;  %v57_v16 = vrot.slane %v38_v6, 1  ;;  %v58_v17 = vrot.slane %v40_v7, 2  ;;  %s336_s0 = smov 4   ;;  %v56_v18 = vor.u32 %v55_v12, %v54_v11  ;;  %s337_s22 = smov 12  }
   0x7   :  { %v43_v14 = vor.u32 %v42_v10, %v38_v6  ;;  %292 = vmatpush3.bf16.msra.mxu0 %v308_v13  ;;  %v309_v19 = vld [vmem:[%s390_s1 + $0x8] ss:$0 sps:$4 sm:$0x33]   ;;  %vm168_vm0 = vcmask 1041408   ;;  %v65_v22 = vrot.slane %v307_v1, 2  ;;  %v96_v27 = vlaneseq  ;;  %s339_s24 = smov [#allocation2]  }
   0x8   :  { %52 = vrot.lane.b32.xlu0 %v49_v8, %s335_s17  ;;  %299 = vmatprep.subr.msk.bf16.mxu0 %vm168_vm0, %v309_v19  ;;  %v170_v20 = vsel %vm168_vm0, %v309_v19, 0  ;;  %v59_v21 = vor.u32 %v58_v17, %v57_v16  ;;  %v338_v25 = vmov 1983009808   ;;  %vm70_vm1 = vcmask 31744   ;;  %s272_s25 = sshll.u32 %s339_s24, 4  ;;  %s273_s25 = int_to_ptr.vmem [resolvable:$true] %s272_s25 }
   0x9   :  { %46 = vrot.lane.b32.xlu1 %v43_v14, %s336_s0  ;;  %v94_v26 = vunpack.c.l.s4 %v338_v25  ;;  %v97_v31 = vshrl.u32 %v96_v27, 7  ;;  %vm75_vm2 = vcmask 64512   ;;  %vm80_vm3 = vcmask 97280   ;;  %s310_s26 = scalar_lea.vmem %s273_s25, 32  ;;  %p315_p1 = scmp.lt.s32.totalorder %s273_s25, %s273_s25 }
   0xa   :  { %vm85_vm4 = vcmask 130048   ;;  %vm161_vm5 = vcmask 162816   ;;  %vm231_vm6 = vcmask 1043456   ;;  %vm262_vm7 = vcmask 1041409   ;;  %p311_p0 = scmp.ne.s32.totalorder %s273_s25, %s310_s26  ;;  %p316_p2 = scmp.lt.s32.totalorder %s310_s26, %s310_s26 }
   0xb   :  { %294 = vmatpush3.bf16.msra.mxu0 %v170_v20  ;;  %v95_v30 = vunpack.c.0.s8 %v94_v26  ;;  %v286_v20 = vld [vmem:[%s391_s2] ss:$0 sm:$0xff] }
   0xc   :  { %44 = vrot.lane.b32.xlu0 %v36_v15, %s336_s0  ;;  %p317_p3 = por %p316_p2, %p315_p1 }
   0xd   :  { %60 = vrot.lane.b32.xlu1 %v56_v18, %s337_s22  ;;  %v98_v35 = vsub.s32 %v95_v30, %v97_v31 }
   0xe   :  { %p318_p4 = pnand %p317_p3, %p311_p0 }
  0x10   :  { %62 = vrot.lane.b32.xlu0 %v59_v21, %s337_s22 }
  0x11   :  { %68 = vrot.lane.b32.xlu1 %v65_v22, %s334_s16 }
  0x76   :  { %v67_v23 = vpop.permute.xlu1 %66  ;;  %v51_v24 = vpop.permute.xlu0 %50 }
  0x7a   :  { %v53_v28 = vpop.permute.xlu0 %52 }
  0x7b   :  { %v47_v29 = vpop.permute.xlu1 %46 }
  0x7c   :  { %v74_v33 = vsel %vm70_vm1, %v307_v1, %v47_v29 }
  0x7d   :  { %v79_v39 = vsel %vm75_vm2, %v74_v33, %v53_v28 }
  0x7e   :  { %v45_v32 = vpop.permute.xlu0 %44 }
  0x7f   :  { %v72_v34 = vsel %vm70_vm1, %v306_v0, %v45_v32  ;;  %v61_v36 = vpop.permute.xlu1 %60 }
  0x80   :  { %v77_v37 = vsel %vm75_vm2, %v72_v34, %v51_v24 }
  0x81   :  { %v82_v38 = vsel %vm80_vm3, %v77_v37, %v61_v36 }
  0x82   :  { %v87_v40 = vsel %vm85_vm4, %v82_v38, %v67_v23  ;;  %v63_v41 = vpop.permute.xlu0 %62 }
  0x83   :  { %v92_v42 = vcombine.high %v87_v40, %v87_v40  ;;  %v99_v43 = vrot.slane %v87_v40, %v98_v35  ;;  %v84_v44 = vsel %vm80_vm3, %v79_v39, %v63_v41  ;;  %v69_v45 = vpop.permute.xlu1 %68 }
  0x84   :  { %v89_v46 = vsel %vm85_vm4, %v84_v44, %v69_v45 }
  0x85   :  { %v107_v47 = vcombine.high %v99_v43, %v99_v43  ;;  %v106_v48 = vrot.slane %v92_v42, %v98_v35  ;;  %v108_v49 = vcombine.high %v89_v46, %v89_v46  ;;  %v115_v50 = vrot.slane %v89_v46, %v98_v35 }
  0x87   :  { %v122_v51 = vrot.slane %v108_v49, %v98_v35  ;;  %v123_v52 = vcombine.high %v115_v50, %v115_v50  ;;  %v128_v53 = vcombine.low %v106_v48, %v115_v50  ;;  %v127_v54 = vcombine.low %v99_v43, %v107_v47 }
  0x89   :  { %v144_v55 = vcombine.low %v123_v52, %v122_v51  ;;  %v135_v56 = vrot.slane %v127_v54, %v98_v35  ;;  %v142_v57 = vrot.slane %v128_v53, %v98_v35 }
  0x8b   :  { %v143_v58 = vcombine.low %v135_v56, %v142_v57  ;;  %v151_v59 = vrot.slane %v144_v55, %v98_v35 }
  0x8d   :  { %295 = vmatprep.mubr.msk.bf16.mxu0 %vm161_vm5, %v143_v58 }
  0x8e   :  { %296 = vmatmul.mubr.msk.bf16.vlgmr.msra.gmra.mrb[0].mxu0 %vm161_vm5, %v151_v59 }
 0x161   :  { %v297_v60 = vpop.f32.mrb[0].mxu0 }
 0x162   :  { %v206_v61 = vpop.f32.mrb[1].mxu0  ;;  %v225_v0 = vcombine.high %v297_v60, %v297_v60 }
 0x163   :  { %v223_v62 = vcombine.high %v206_v61, %v206_v61  ;;  %v298_v63 = vpop.f32.mrb[2].mxu0 }
 0x164   :  { %v209_v1 = vpop.f32.mrb[3].mxu0  ;;  %v240_v7 = vsel %vm231_vm6, %v225_v0, -inf }
 0x165   :  { %v227_v2 = vcombine.low %v206_v61, %v223_v62  ;;  %v224_v3 = vcombine.high %v209_v1, %v209_v1  ;;  %v232_v4 = vsel %vm231_vm6, %v209_v1, -inf }
 0x167   :  { %v228_v5 = vcombine.low %v224_v3, %v297_v60  ;;  %v233_v6 = vmax.f32 %v227_v2, %v232_v4 }
 0x169   :  { %v234_v8 = vrot.slane %v233_v6, 4  ;;  %v241_v9 = vmax.f32 %v228_v5, %v240_v7 }
 0x16b   :  { %v235_v10 = vmax.f32 %v233_v6, %v234_v8  ;;  %v242_v11 = vrot.slane %v241_v9, 4 }
 0x16d   :  { %v236_v12 = vrot.slane %v235_v10, 2  ;;  %v243_v13 = vmax.f32 %v241_v9, %v242_v11 }
 0x16f   :  { %v237_v14 = vmax.f32 %v235_v10, %v236_v12  ;;  %v244_v15 = vrot.slane %v243_v13, 2 }
 0x171   :  { %v238_v16 = vrot.slane %v237_v14, 1  ;;  %v245_v17 = vmax.f32 %v243_v13, %v244_v15 }
 0x173   :  { %v239_v18 = vmax.f32 %v237_v14, %v238_v16  ;;  %v246_v19 = vrot.slane %v245_v17, 1 }
 0x175   :  { %v247_v21 = vmax.f32 %v245_v17, %v246_v19  ;;  %v255_v22 = vadd.f32 %v286_v20, %v239_v18 }
 0x177   :  { %v256_v23 = vadd.f32 %v286_v20, %v247_v21  ;;  %v257_v25 = vmax.f32 %v255_v22, 0.0 }
 0x179   :  { %v258_v24 = vmax.f32 %v256_v23, 0.0 }
 0x17b   :  { %v261_v26 = vrot.slane %v258_v24, 7 }
 0x17d   :  { %v263_v27 = vsel %vm262_vm7, %v261_v26, %v257_v25 }
 0x17e   :  { %265 = vst [vmem:[#allocation2] sm:$0x3] %v263_v27 }
 0x17f   :  { %321 = shalt.err (!%p318_p4)
}
 0x180   :  { %s322_s28 = scalar_lea.hbm %s392_s3, 32 }
 0x181   :  { %p323_p5 = scmp.ne.s32.totalorder %s392_s3, %s322_s28  ;;  %p326_p6 = scmp.lt.u32.totalorder %s322_s28, %s392_s3 }
 0x183   :  { %p328_p7 = pnand %p326_p6, %p323_p5 }
 0x185   :  { %331 = shalt.err (!%p328_p7)
}
 0x186   :  { %275 = dma.vmem_to_hbm [thread:$0]  %s273_s25, 32, %s392_s3, [#allocation3]  }
 0x187   :  { %332 = dma.done.wait [#allocation3], 32  }
 0x188   :  { %333 = vsyncadd [#allocation3], 4294967264 }
 0x189   :  { %279 = vsyncpa [#allocation3], 1 }

</bundles_post_ra>
